<compile_context>
chip_gen: v6e
topology: v6e:2x2x1
jax: 0.10.0
libtpu: 0.0.40
codegen_flags: <defaults>
</compile_context>

<pallas_src>
import functools

import jax
import jax.numpy as jnp
from jax.experimental import pallas as pl
from jax.experimental.pallas import tpu as pltpu


def _round_up(x, m):
    return (x + m - 1) // m * m


# --------------------------------- kernel ---------------------------------
def rkhs_block_kernel(x_ref, w1_ref, w2_ref, mask_ref, o_ref, *, H, W, big_k):
    """Fused block for B images:  out = conv2(relu(conv1(x))) + x  (identity shortcut).

    x_ref    : (B, Cp, HW)   bf16   channels on sublanes, flattened pixels on lanes
    w1_ref   : (Cp, 9*Cp)    bf16   if big_k else (9, Cp, Cp)
    w2_ref   : (Cp, 9*Cp)    bf16   if big_k else (9, Cp, Cp)
    mask_ref : (9, 1, HW)    bf16   per-tap border-validity mask
    o_ref    : (B, Cp, HW)   f32
    """
    HW = H * W
    B = x_ref.shape[0]

    def shift_tap(v, tap):
        # Shifting the flattened (h*W + w) pixel axis by dh*W + dw is a lane
        # rotation (XLU); the mask zeroes positions whose 3x3 source pixel falls
        # outside the image (this implements padding=1 without a padded buffer).
        kh, kw = tap // 3, tap % 3
        k = (kh - 1) * W + (kw - 1)           # flat source offset of this tap
        s = (-k) % HW                         # roll shift so out[p] = inp[p + k]
        rolled = v if s == 0 else pltpu.roll(v, s, axis=1)
        return rolled * mask_ref[tap].astype(v.dtype)     # (Cp,HW) * (1,HW)

    def conv3x3(v, w_ref):
        if big_k:
            # Small Cp: one MXU matmul with K = 9*Cp (pieces built in f32, single
            # cast of the concatenated patches to bf16 -- validated path).
            patches = jnp.concatenate([shift_tap(v, t) for t in range(9)], axis=0)
            return jnp.dot(w_ref[...], patches.astype(jnp.bfloat16),
                           preferred_element_type=jnp.float32)
        # Large Cp: 9-tap accumulate in f32; mask applied in bf16; no big live
        # patches value.
        acc = jnp.dot(w_ref[0], shift_tap(v, 0), preferred_element_type=jnp.float32)
        for t in range(1, 9):
            acc = acc + jnp.dot(w_ref[t], shift_tap(v, t),
                                preferred_element_type=jnp.float32)
        return acc

    def per_image(b, carry):
        if big_k:
            h1 = jnp.maximum(conv3x3(x_ref[b].astype(jnp.float32), w1_ref), 0.0)
            out = conv3x3(h1, w2_ref)
        else:
            h1 = jnp.maximum(conv3x3(x_ref[b], w1_ref), 0.0)
            out = conv3x3(h1.astype(jnp.bfloat16), w2_ref)
        # Identity shortcut: re-read the (VMEM-resident) input block late instead
        # of keeping x live across both convs; add in f32.
        o_ref[b] = out + x_ref[b].astype(jnp.float32)
        return carry

    if B == 1:
        per_image(0, 0)
    else:
        jax.lax.fori_loop(0, B, per_image, 0)


# ------------------------------ host helpers ------------------------------
def _pack_w_bigk(w_oihw, Cpo, Cpi):
    """(Cout, Cin, 3, 3) -> (Cpo, 9*Cpi) bf16, column index = (kh*3+kw)*Cpi + cin."""
    Cout, Cin, _, _ = w_oihw.shape
    w = jnp.transpose(w_oihw.astype(jnp.float32), (0, 2, 3, 1))    # (Cout, kh, kw, Cin)
    w = jnp.pad(w, ((0, Cpo - Cout), (0, 0), (0, 0), (0, Cpi - Cin)))
    return w.reshape(Cpo, 9 * Cpi).astype(jnp.bfloat16)


def _pack_w_taps(w_oihw, Cpo, Cpi):
    """(Cout, Cin, 3, 3) -> (9, Cpo, Cpi) bf16, tap index = kh*3 + kw."""
    Cout, Cin, _, _ = w_oihw.shape
    w = jnp.transpose(w_oihw.astype(jnp.float32), (2, 3, 0, 1))    # (kh, kw, Cout, Cin)
    w = jnp.pad(w, ((0, 0), (0, 0), (0, Cpo - Cout), (0, Cpi - Cin)))
    return w.reshape(9, Cpo, Cpi).astype(jnp.bfloat16)


def _tap_masks(H, W):
    """(9, 1, H*W) bf16: 1 where tap (kh,kw)'s source pixel is inside the image."""
    HW = H * W
    hh = jnp.arange(HW, dtype=jnp.int32) // W
    ww = jnp.arange(HW, dtype=jnp.int32) % W
    rows = []
    for kh in range(3):
        for kw in range(3):
            dh, dw = kh - 1, kw - 1
            rows.append((hh + dh >= 0) & (hh + dh < H) &
                        (ww + dw >= 0) & (ww + dw < W))
    return jnp.stack(rows, axis=0).astype(jnp.bfloat16).reshape(9, 1, HW)


def _choose_batch_block(N, Cp, HW, budget_bytes=8 << 20, cap=64):
    """Images per grid step.  Budgeted for v7x's smaller VMEM; keeps >=2..4 grid
    steps when N allows so megacore (parallel batch axis) has work to split."""
    per_image_io = 2 * (2 * Cp * HW) + 2 * (4 * Cp * HW)   # bf16 in + f32 out, x2 buffers
    tmp = 32 * Cp * HW                                     # per-image temporaries (B-independent)
    b_vmem = max(1, (budget_bytes - tmp) // per_image_io)
    b_steps = max(1, (N + 3) // 4)                         # keep >= ~4 steps when possible
    return int(max(1, min(b_vmem, b_steps, cap, N)))


def rkhs_block_forward(x_nchw, w1_oihw, w2_oihw, *, batch_block=None):
    """x_nchw: (N, Cin, H, W); w*: (Cout, Cin, 3, 3). Returns (N, Cout, H, W) f32."""
    N, Cin, H, W = x_nchw.shape
    Cout = w1_oihw.shape[0]
    # TODO(synk): stride != 1 / in_planes != planes (1x1-conv+BN shortcut) unsupported.
    assert Cin == Cout, "identity shortcut requires in_planes == planes"
    HW = H * W
    assert HW % 128 == 0, "H*W must be a multiple of 128 for the lane-dense layout"

    Cp = _round_up(max(Cin, 8), 8)     # sublane-align the channel axis
    big_k = Cp < 64                    # concatenated-K matmul only for small Cp

    # Activations live in HBM as bf16 (they are bf16 MXU operands anyway); NCHW with
    # spatial dims flattened IS the kernel layout -> no transpose, no spatial pad.
    x = x_nchw.astype(jnp.bfloat16).reshape(N, Cin, HW)
    if Cp != Cin:
        x = jnp.pad(x, ((0, 0), (0, Cp - Cin), (0, 0)))

    B = batch_block if batch_block is not None else _choose_batch_block(N, Cp, HW)
    B = int(max(1, min(B, N)))
    G = (N + B - 1) // B
    N_pad = G * B
    if N_pad != N:
        x = jnp.pad(x, ((0, N_pad - N), (0, 0), (0, 0)))

    if big_k:
        w1 = _pack_w_bigk(w1_oihw, Cp, Cp)
        w2 = _pack_w_bigk(w2_oihw, Cp, Cp)
        w_specs = [pl.BlockSpec((Cp, 9 * Cp), lambda g: (0, 0)),
                   pl.BlockSpec((Cp, 9 * Cp), lambda g: (0, 0))]
    else:
        w1 = _pack_w_taps(w1_oihw, Cp, Cp)
        w2 = _pack_w_taps(w2_oihw, Cp, Cp)
        w_specs = [pl.BlockSpec((9, Cp, Cp), lambda g: (0, 0, 0)),
                   pl.BlockSpec((9, Cp, Cp), lambda g: (0, 0, 0))]
    mask = _tap_masks(H, W)            # (9, 1, HW) bf16 -- tiny, VMEM-resident

    kernel = functools.partial(rkhs_block_kernel, H=H, W=W, big_k=big_k)
    out = pl.pallas_call(
        kernel,
        out_shape=jax.ShapeDtypeStruct((N_pad, Cp, HW), jnp.float32),
        grid=(G,),
        in_specs=[pl.BlockSpec((B, Cp, HW), lambda g: (g, 0, 0))]   # B images / step
                 + w_specs
                 + [pl.BlockSpec((9, 1, HW), lambda g: (0, 0, 0))],  # mask: resident
        out_specs=pl.BlockSpec((B, Cp, HW), lambda g: (g, 0, 0)),
        compiler_params=pltpu.CompilerParams(
            dimension_semantics=("parallel",),      # shard batch blocks across TCs (v7x)
            vmem_limit_bytes=32 * 1024 * 1024,      # safe on v5e/v6e/v7x; headroom for B
        ),
    )(x, w1, w2, mask)

    if N_pad != N:
        out = out[:N]
    if Cp != Cout:                     # only when the channel count is not 8-aligned
        out = out[:, :Cout, :]
    return out.reshape(N, Cout, H, W)


# ------------------------- pure-JAX reference -------------------------
def _conv3x3_ref(x_nchw, w_oihw):
    return jax.lax.conv_general_dilated(
        x_nchw, w_oihw, window_strides=(1, 1), padding=((1, 1), (1, 1)),
        dimension_numbers=("NCHW", "OIHW", "NCHW"),
    )


def rkhs_block_ref(x_nchw, w1, w2):
    out = jax.nn.relu(_conv3x3_ref(x_nchw, w1))
    out = _conv3x3_ref(out, w2)
    return out + x_nchw


if __name__ == "__main__":
    def check(x, w1, w2, batch_block=None, atol=1e-1, rtol=5e-2):
        out = jax.block_until_ready(rkhs_block_forward(x, w1, w2, batch_block=batch_block))
        ref = jax.block_until_ready(rkhs_block_ref(x, w1, w2))
        return (out.shape == ref.shape) and bool(jnp.allclose(out, ref, atol=atol, rtol=rtol))

    key = jax.random.PRNGKey(0)
    kx, kw1, kw2, kx3, kxw, kw3, kw4 = jax.random.split(key, 7)

    ok = True

    # Case 1: module defaults -- N=2, in_planes=planes=4, 16x16.
    N, C, H, W = 2, 4, 16, 16
    x = jax.random.normal(kx, (N, C, H, W), dtype=jnp.float32)
    # conv1: randn(planes, in_planes, 3, 3) / sqrt(9 * in_planes), frozen
    w1 = jax.random.normal(kw1, (C, C, 3, 3), dtype=jnp.float32) / (9 * C) ** 0.5
    # conv2: zero_init=True -> zeros; also test the nonzero-weight analog.
    w2_zero = jnp.zeros((C, C, 3, 3), dtype=jnp.float32)
    w2_rand = jax.random.normal(kw2, (C, C, 3, 3), dtype=jnp.float32) / (9 * C) ** 0.5

    ok &= check(x, w1, w2_zero)                  # default B heuristic (B=1, grid=2)
    ok &= check(x, w1, w2_rand)
    ok &= check(x, w1, w2_rand, batch_block=2)   # batched path: 2 images per grid step

    # Case 2: batch padding (N not a multiple of B), nonzero image borders.
    x3 = jax.random.normal(kx3, (3, C, H, W), dtype=jnp.float32)
    ok &= check(x3, w1, w2_rand, batch_block=2)

    # Case 3: wider channels -> exercises the per-tap accumulate path (Cp >= 64).
    C2 = 64
    xw = jax.random.normal(kxw, (2, C2, H, W), dtype=jnp.float32)
    w3 = jax.random.normal(kw3, (C2, C2, 3, 3), dtype=jnp.float32) / (9 * C2) ** 0.5
    w4 = jax.random.normal(kw4, (C2, C2, 3, 3), dtype=jnp.float32) / (9 * C2) ** 0.5
    ok &= check(xw, w3, w4, batch_block=2)

    print("KERNEL_OK" if ok else "KERNEL_MISMATCH")
</pallas_src>

<mosaic_0001>
module attributes {stable_mosaic.version = 11 : i64} {
  func.func @rkhs_block_kernel(%arg0: i32, %arg1: memref<1x8x256xbf16, #tpu.memory_space<vmem>>, %arg2: memref<8x72xbf16, #tpu.memory_space<vmem>>, %arg3: memref<8x72xbf16, #tpu.memory_space<vmem>>, %arg4: memref<9x1x256xbf16, #tpu.memory_space<vmem>>, %arg5: memref<1x8x256xf32, #tpu.memory_space<vmem>>) attributes {dimension_semantics = [#tpu.dimension_semantics<parallel>], iteration_bounds = array<i64: 2>, scalar_prefetch = 0 : i64, scratch_operands = 0 : i64, tpu.core_type = #tpu.core_type<tc>, window_params = [{transform_indices = @transform_0, window_bounds = array<i64: 1, 8, 256>}, {pipeline_mode = #tpu.pipeline_mode<synchronous>, transform_indices = @transform_1, window_bounds = array<i64: 8, 72>}, {pipeline_mode = #tpu.pipeline_mode<synchronous>, transform_indices = @transform_2, window_bounds = array<i64: 8, 72>}, {pipeline_mode = #tpu.pipeline_mode<synchronous>, transform_indices = @transform_3, window_bounds = array<i64: 9, 1, 256>}, {transform_indices = @transform_4, window_bounds = array<i64: 1, 8, 256>}]} {
    %c0 = arith.constant 0 : index
    %c0_0 = arith.constant 0 : index
    %c0_1 = arith.constant 0 : index
    %0 = vector.load %arg1[%c0, %c0_0, %c0_1] : memref<1x8x256xbf16, #tpu.memory_space<vmem>>, vector<1x8x256xbf16>
    %1 = vector.shape_cast %0 : vector<1x8x256xbf16> to vector<8x256xbf16>
    %2 = arith.extf %1 : vector<8x256xbf16> to vector<8x256xf32>
    %c17_i32 = arith.constant 17 : i32
    %3 = tpu.dynamic_rotate %2 by %c17_i32 dim 1 : vector<8x256xf32>, i32 -> vector<8x256xf32>
    %c0_2 = arith.constant 0 : index
    %c0_3 = arith.constant 0 : index
    %c0_4 = arith.constant 0 : index
    %4 = vector.load %arg4[%c0_2, %c0_3, %c0_4] : memref<9x1x256xbf16, #tpu.memory_space<vmem>>, vector<1x1x256xbf16>
    %5 = vector.shape_cast %4 : vector<1x1x256xbf16> to vector<1x256xbf16>
    %6 = arith.extf %5 : vector<1x256xbf16> to vector<1x256xf32>
    %7 = vector.broadcast %6 : vector<1x256xf32> to vector<8x256xf32>
    %8 = arith.mulf %3, %7 : vector<8x256xf32>
    %c16_i32 = arith.constant 16 : i32
    %9 = tpu.dynamic_rotate %2 by %c16_i32 dim 1 : vector<8x256xf32>, i32 -> vector<8x256xf32>
    %c1 = arith.constant 1 : index
    %c0_5 = arith.constant 0 : index
    %c0_6 = arith.constant 0 : index
    %10 = vector.load %arg4[%c1, %c0_5, %c0_6] : memref<9x1x256xbf16, #tpu.memory_space<vmem>>, vector<1x1x256xbf16>
    %11 = vector.shape_cast %10 : vector<1x1x256xbf16> to vector<1x256xbf16>
    %12 = arith.extf %11 : vector<1x256xbf16> to vector<1x256xf32>
    %13 = vector.broadcast %12 : vector<1x256xf32> to vector<8x256xf32>
    %14 = arith.mulf %9, %13 : vector<8x256xf32>
    %c15_i32 = arith.constant 15 : i32
    %15 = tpu.dynamic_rotate %2 by %c15_i32 dim 1 : vector<8x256xf32>, i32 -> vector<8x256xf32>
    %c2 = arith.constant 2 : index
    %c0_7 = arith.constant 0 : index
    %c0_8 = arith.constant 0 : index
    %16 = vector.load %arg4[%c2, %c0_7, %c0_8] : memref<9x1x256xbf16, #tpu.memory_space<vmem>>, vector<1x1x256xbf16>
    %17 = vector.shape_cast %16 : vector<1x1x256xbf16> to vector<1x256xbf16>
    %18 = arith.extf %17 : vector<1x256xbf16> to vector<1x256xf32>
    %19 = vector.broadcast %18 : vector<1x256xf32> to vector<8x256xf32>
    %20 = arith.mulf %15, %19 : vector<8x256xf32>
    %c1_i32 = arith.constant 1 : i32
    %21 = tpu.dynamic_rotate %2 by %c1_i32 dim 1 : vector<8x256xf32>, i32 -> vector<8x256xf32>
    %c3 = arith.constant 3 : index
    %c0_9 = arith.constant 0 : index
    %c0_10 = arith.constant 0 : index
    %22 = vector.load %arg4[%c3, %c0_9, %c0_10] : memref<9x1x256xbf16, #tpu.memory_space<vmem>>, vector<1x1x256xbf16>
    %23 = vector.shape_cast %22 : vector<1x1x256xbf16> to vector<1x256xbf16>
    %24 = arith.extf %23 : vector<1x256xbf16> to vector<1x256xf32>
    %25 = vector.broadcast %24 : vector<1x256xf32> to vector<8x256xf32>
    %26 = arith.mulf %21, %25 : vector<8x256xf32>
    %c4 = arith.constant 4 : index
    %c0_11 = arith.constant 0 : index
    %c0_12 = arith.constant 0 : index
    %27 = vector.load %arg4[%c4, %c0_11, %c0_12] : memref<9x1x256xbf16, #tpu.memory_space<vmem>>, vector<1x1x256xbf16>
    %28 = vector.shape_cast %27 : vector<1x1x256xbf16> to vector<1x256xbf16>
    %29 = arith.extf %28 : vector<1x256xbf16> to vector<1x256xf32>
    %30 = vector.broadcast %29 : vector<1x256xf32> to vector<8x256xf32>
    %31 = arith.mulf %2, %30 : vector<8x256xf32>
    %c255_i32 = arith.constant 255 : i32
    %32 = tpu.dynamic_rotate %2 by %c255_i32 dim 1 : vector<8x256xf32>, i32 -> vector<8x256xf32>
    %c5 = arith.constant 5 : index
    %c0_13 = arith.constant 0 : index
    %c0_14 = arith.constant 0 : index
    %33 = vector.load %arg4[%c5, %c0_13, %c0_14] : memref<9x1x256xbf16, #tpu.memory_space<vmem>>, vector<1x1x256xbf16>
    %34 = vector.shape_cast %33 : vector<1x1x256xbf16> to vector<1x256xbf16>
    %35 = arith.extf %34 : vector<1x256xbf16> to vector<1x256xf32>
    %36 = vector.broadcast %35 : vector<1x256xf32> to vector<8x256xf32>
    %37 = arith.mulf %32, %36 : vector<8x256xf32>
    %c241_i32 = arith.constant 241 : i32
    %38 = tpu.dynamic_rotate %2 by %c241_i32 dim 1 : vector<8x256xf32>, i32 -> vector<8x256xf32>
    %c6 = arith.constant 6 : index
    %c0_15 = arith.constant 0 : index
    %c0_16 = arith.constant 0 : index
    %39 = vector.load %arg4[%c6, %c0_15, %c0_16] : memref<9x1x256xbf16, #tpu.memory_space<vmem>>, vector<1x1x256xbf16>
    %40 = vector.shape_cast %39 : vector<1x1x256xbf16> to vector<1x256xbf16>
    %41 = arith.extf %40 : vector<1x256xbf16> to vector<1x256xf32>
    %42 = vector.broadcast %41 : vector<1x256xf32> to vector<8x256xf32>
    %43 = arith.mulf %38, %42 : vector<8x256xf32>
    %c240_i32 = arith.constant 240 : i32
    %44 = tpu.dynamic_rotate %2 by %c240_i32 dim 1 : vector<8x256xf32>, i32 -> vector<8x256xf32>
    %c7 = arith.constant 7 : index
    %c0_17 = arith.constant 0 : index
    %c0_18 = arith.constant 0 : index
    %45 = vector.load %arg4[%c7, %c0_17, %c0_18] : memref<9x1x256xbf16, #tpu.memory_space<vmem>>, vector<1x1x256xbf16>
    %46 = vector.shape_cast %45 : vector<1x1x256xbf16> to vector<1x256xbf16>
    %47 = arith.extf %46 : vector<1x256xbf16> to vector<1x256xf32>
    %48 = vector.broadcast %47 : vector<1x256xf32> to vector<8x256xf32>
    %49 = arith.mulf %44, %48 : vector<8x256xf32>
    %c239_i32 = arith.constant 239 : i32
    %50 = tpu.dynamic_rotate %2 by %c239_i32 dim 1 : vector<8x256xf32>, i32 -> vector<8x256xf32>
    %c8 = arith.constant 8 : index
    %c0_19 = arith.constant 0 : index
    %c0_20 = arith.constant 0 : index
    %51 = vector.load %arg4[%c8, %c0_19, %c0_20] : memref<9x1x256xbf16, #tpu.memory_space<vmem>>, vector<1x1x256xbf16>
    %52 = vector.shape_cast %51 : vector<1x1x256xbf16> to vector<1x256xbf16>
    %53 = arith.extf %52 : vector<1x256xbf16> to vector<1x256xf32>
    %54 = vector.broadcast %53 : vector<1x256xf32> to vector<8x256xf32>
    %55 = arith.mulf %50, %54 : vector<8x256xf32>
    %56 = tpu.concatenate %8, %14, %20, %26, %31, %37, %43, %49, %55 in 0 : vector<8x256xf32>, vector<8x256xf32>, vector<8x256xf32>, vector<8x256xf32>, vector<8x256xf32>, vector<8x256xf32>, vector<8x256xf32>, vector<8x256xf32>, vector<8x256xf32> -> vector<72x256xf32>
    %c0_21 = arith.constant 0 : index
    %c0_22 = arith.constant 0 : index
    %57 = vector.load %arg2[%c0_21, %c0_22] : memref<8x72xbf16, #tpu.memory_space<vmem>>, vector<8x72xbf16>
    %58 = arith.truncf %56 : vector<72x256xf32> to vector<72x256xbf16>
    %cst = arith.constant dense<0.000000e+00> : vector<8x256xf32>
    %59 = tpu.matmul %57, %58, %cst {dimension_numbers = #tpu.dot_dimension_numbers<[1], [0], [0], [1], [0, 0, 1, 1], [], []>} : vector<8x72xbf16>, vector<72x256xbf16>, vector<8x256xf32> -> vector<8x256xf32>
    %cst_23 = arith.constant 0.000000e+00 : f32
    %60 = vector.broadcast %cst_23 : f32 to vector<8x256xf32>
    %61 = arith.maximumf %59, %60 : vector<8x256xf32>
    %c17_i32_24 = arith.constant 17 : i32
    %62 = tpu.dynamic_rotate %61 by %c17_i32_24 dim 1 : vector<8x256xf32>, i32 -> vector<8x256xf32>
    %c0_25 = arith.constant 0 : index
    %c0_26 = arith.constant 0 : index
    %c0_27 = arith.constant 0 : index
    %63 = vector.load %arg4[%c0_25, %c0_26, %c0_27] : memref<9x1x256xbf16, #tpu.memory_space<vmem>>, vector<1x1x256xbf16>
    %64 = vector.shape_cast %63 : vector<1x1x256xbf16> to vector<1x256xbf16>
    %65 = arith.extf %64 : vector<1x256xbf16> to vector<1x256xf32>
    %66 = vector.broadcast %65 : vector<1x256xf32> to vector<8x256xf32>
    %67 = arith.mulf %62, %66 : vector<8x256xf32>
    %c16_i32_28 = arith.constant 16 : i32
    %68 = tpu.dynamic_rotate %61 by %c16_i32_28 dim 1 : vector<8x256xf32>, i32 -> vector<8x256xf32>
    %c1_29 = arith.constant 1 : index
    %c0_30 = arith.constant 0 : index
    %c0_31 = arith.constant 0 : index
    %69 = vector.load %arg4[%c1_29, %c0_30, %c0_31] : memref<9x1x256xbf16, #tpu.memory_space<vmem>>, vector<1x1x256xbf16>
    %70 = vector.shape_cast %69 : vector<1x1x256xbf16> to vector<1x256xbf16>
    %71 = arith.extf %70 : vector<1x256xbf16> to vector<1x256xf32>
    %72 = vector.broadcast %71 : vector<1x256xf32> to vector<8x256xf32>
    %73 = arith.mulf %68, %72 : vector<8x256xf32>
    %c15_i32_32 = arith.constant 15 : i32
    %74 = tpu.dynamic_rotate %61 by %c15_i32_32 dim 1 : vector<8x256xf32>, i32 -> vector<8x256xf32>
    %c2_33 = arith.constant 2 : index
    %c0_34 = arith.constant 0 : index
    %c0_35 = arith.constant 0 : index
    %75 = vector.load %arg4[%c2_33, %c0_34, %c0_35] : memref<9x1x256xbf16, #tpu.memory_space<vmem>>, vector<1x1x256xbf16>
    %76 = vector.shape_cast %75 : vector<1x1x256xbf16> to vector<1x256xbf16>
    %77 = arith.extf %76 : vector<1x256xbf16> to vector<1x256xf32>
    %78 = vector.broadcast %77 : vector<1x256xf32> to vector<8x256xf32>
    %79 = arith.mulf %74, %78 : vector<8x256xf32>
    %c1_i32_36 = arith.constant 1 : i32
    %80 = tpu.dynamic_rotate %61 by %c1_i32_36 dim 1 : vector<8x256xf32>, i32 -> vector<8x256xf32>
    %c3_37 = arith.constant 3 : index
    %c0_38 = arith.constant 0 : index
    %c0_39 = arith.constant 0 : index
    %81 = vector.load %arg4[%c3_37, %c0_38, %c0_39] : memref<9x1x256xbf16, #tpu.memory_space<vmem>>, vector<1x1x256xbf16>
    %82 = vector.shape_cast %81 : vector<1x1x256xbf16> to vector<1x256xbf16>
    %83 = arith.extf %82 : vector<1x256xbf16> to vector<1x256xf32>
    %84 = vector.broadcast %83 : vector<1x256xf32> to vector<8x256xf32>
    %85 = arith.mulf %80, %84 : vector<8x256xf32>
    %c4_40 = arith.constant 4 : index
    %c0_41 = arith.constant 0 : index
    %c0_42 = arith.constant 0 : index
    %86 = vector.load %arg4[%c4_40, %c0_41, %c0_42] : memref<9x1x256xbf16, #tpu.memory_space<vmem>>, vector<1x1x256xbf16>
    %87 = vector.shape_cast %86 : vector<1x1x256xbf16> to vector<1x256xbf16>
    %88 = arith.extf %87 : vector<1x256xbf16> to vector<1x256xf32>
    %89 = vector.broadcast %88 : vector<1x256xf32> to vector<8x256xf32>
    %90 = arith.mulf %61, %89 : vector<8x256xf32>
    %c255_i32_43 = arith.constant 255 : i32
    %91 = tpu.dynamic_rotate %61 by %c255_i32_43 dim 1 : vector<8x256xf32>, i32 -> vector<8x256xf32>
    %c5_44 = arith.constant 5 : index
    %c0_45 = arith.constant 0 : index
    %c0_46 = arith.constant 0 : index
    %92 = vector.load %arg4[%c5_44, %c0_45, %c0_46] : memref<9x1x256xbf16, #tpu.memory_space<vmem>>, vector<1x1x256xbf16>
    %93 = vector.shape_cast %92 : vector<1x1x256xbf16> to vector<1x256xbf16>
    %94 = arith.extf %93 : vector<1x256xbf16> to vector<1x256xf32>
    %95 = vector.broadcast %94 : vector<1x256xf32> to vector<8x256xf32>
    %96 = arith.mulf %91, %95 : vector<8x256xf32>
    %c241_i32_47 = arith.constant 241 : i32
    %97 = tpu.dynamic_rotate %61 by %c241_i32_47 dim 1 : vector<8x256xf32>, i32 -> vector<8x256xf32>
    %c6_48 = arith.constant 6 : index
    %c0_49 = arith.constant 0 : index
    %c0_50 = arith.constant 0 : index
    %98 = vector.load %arg4[%c6_48, %c0_49, %c0_50] : memref<9x1x256xbf16, #tpu.memory_space<vmem>>, vector<1x1x256xbf16>
    %99 = vector.shape_cast %98 : vector<1x1x256xbf16> to vector<1x256xbf16>
    %100 = arith.extf %99 : vector<1x256xbf16> to vector<1x256xf32>
    %101 = vector.broadcast %100 : vector<1x256xf32> to vector<8x256xf32>
    %102 = arith.mulf %97, %101 : vector<8x256xf32>
    %c240_i32_51 = arith.constant 240 : i32
    %103 = tpu.dynamic_rotate %61 by %c240_i32_51 dim 1 : vector<8x256xf32>, i32 -> vector<8x256xf32>
    %c7_52 = arith.constant 7 : index
    %c0_53 = arith.constant 0 : index
    %c0_54 = arith.constant 0 : index
    %104 = vector.load %arg4[%c7_52, %c0_53, %c0_54] : memref<9x1x256xbf16, #tpu.memory_space<vmem>>, vector<1x1x256xbf16>
    %105 = vector.shape_cast %104 : vector<1x1x256xbf16> to vector<1x256xbf16>
    %106 = arith.extf %105 : vector<1x256xbf16> to vector<1x256xf32>
    %107 = vector.broadcast %106 : vector<1x256xf32> to vector<8x256xf32>
    %108 = arith.mulf %103, %107 : vector<8x256xf32>
    %c239_i32_55 = arith.constant 239 : i32
    %109 = tpu.dynamic_rotate %61 by %c239_i32_55 dim 1 : vector<8x256xf32>, i32 -> vector<8x256xf32>
    %c8_56 = arith.constant 8 : index
    %c0_57 = arith.constant 0 : index
    %c0_58 = arith.constant 0 : index
    %110 = vector.load %arg4[%c8_56, %c0_57, %c0_58] : memref<9x1x256xbf16, #tpu.memory_space<vmem>>, vector<1x1x256xbf16>
    %111 = vector.shape_cast %110 : vector<1x1x256xbf16> to vector<1x256xbf16>
    %112 = arith.extf %111 : vector<1x256xbf16> to vector<1x256xf32>
    %113 = vector.broadcast %112 : vector<1x256xf32> to vector<8x256xf32>
    %114 = arith.mulf %109, %113 : vector<8x256xf32>
    %115 = tpu.concatenate %67, %73, %79, %85, %90, %96, %102, %108, %114 in 0 : vector<8x256xf32>, vector<8x256xf32>, vector<8x256xf32>, vector<8x256xf32>, vector<8x256xf32>, vector<8x256xf32>, vector<8x256xf32>, vector<8x256xf32>, vector<8x256xf32> -> vector<72x256xf32>
    %c0_59 = arith.constant 0 : index
    %c0_60 = arith.constant 0 : index
    %116 = vector.load %arg3[%c0_59, %c0_60] : memref<8x72xbf16, #tpu.memory_space<vmem>>, vector<8x72xbf16>
    %117 = arith.truncf %115 : vector<72x256xf32> to vector<72x256xbf16>
    %cst_61 = arith.constant dense<0.000000e+00> : vector<8x256xf32>
    %118 = tpu.matmul %116, %117, %cst_61 {dimension_numbers = #tpu.dot_dimension_numbers<[1], [0], [0], [1], [0, 0, 1, 1], [], []>} : vector<8x72xbf16>, vector<72x256xbf16>, vector<8x256xf32> -> vector<8x256xf32>
    %c0_62 = arith.constant 0 : index
    %c0_63 = arith.constant 0 : index
    %c0_64 = arith.constant 0 : index
    %119 = vector.load %arg1[%c0_62, %c0_63, %c0_64] : memref<1x8x256xbf16, #tpu.memory_space<vmem>>, vector<1x8x256xbf16>
    %120 = vector.shape_cast %119 : vector<1x8x256xbf16> to vector<8x256xbf16>
    %121 = arith.extf %120 : vector<8x256xbf16> to vector<8x256xf32>
    %122 = arith.addf %118, %121 : vector<8x256xf32>
    %c0_65 = arith.constant 0 : index
    %c0_66 = arith.constant 0 : index
    %c0_67 = arith.constant 0 : index
    %123 = vector.load %arg5[%c0_65, %c0_66, %c0_67] : memref<1x8x256xf32, #tpu.memory_space<vmem>>, vector<1x8x256xf32>
    %124 = vector.shape_cast %123 : vector<1x8x256xf32> to vector<8x256xf32>
    %125 = vector.shape_cast %122 : vector<8x256xf32> to vector<1x8x256xf32>
    tpu.vector_store %arg5[%c0_65, %c0_66, %c0_67], %125 {strides = array<i32>} : memref<1x8x256xf32, #tpu.memory_space<vmem>>, vector<1x8x256xf32>,
    return
  }
  func.func @transform_0(%arg0: i32) -> (i32, i32, i32) {
    %c0_i32 = arith.constant 0 : i32
    %c0_i32_0 = arith.constant 0 : i32
    %c0_i32_1 = arith.constant 0 : i32
    return %arg0, %c0_i32, %c0_i32_0 : i32, i32, i32
  }
  func.func @transform_1(%arg0: i32) -> (i32, i32) {
    %c0_i32 = arith.constant 0 : i32
    %c0_i32_0 = arith.constant 0 : i32
    %c0_i32_1 = arith.constant 0 : i32
    return %c0_i32, %c0_i32_0 : i32, i32
  }
  func.func @transform_2(%arg0: i32) -> (i32, i32) {
    %c0_i32 = arith.constant 0 : i32
    %c0_i32_0 = arith.constant 0 : i32
    %c0_i32_1 = arith.constant 0 : i32
    return %c0_i32, %c0_i32_0 : i32, i32
  }
  func.func @transform_3(%arg0: i32) -> (i32, i32, i32) {
    %c0_i32 = arith.constant 0 : i32
    %c0_i32_0 = arith.constant 0 : i32
    %c0_i32_1 = arith.constant 0 : i32
    %c0_i32_2 = arith.constant 0 : i32
    return %c0_i32, %c0_i32_0, %c0_i32_1 : i32, i32, i32
  }
  func.func @transform_4(%arg0: i32) -> (i32, i32, i32) {
    %c0_i32 = arith.constant 0 : i32
    %c0_i32_0 = arith.constant 0 : i32
    %c0_i32_1 = arith.constant 0 : i32
    return %arg0, %c0_i32, %c0_i32_0 : i32, i32, i32
  }
}

</mosaic_0001>

<bundles_post_ra>
// kernel: tpu_custom_call.1
= control target key start
LH: loop header
LB: loop body
LE: loop exit
PB: predicated region body
PF: predicated region fallthrough
CT: control target
= control target key end

     0   :  { %9 = vsyncpa [#allocation3], 0  ;;  %s1305_s0 = inlined_call_operand.vmem [shape: bf16[2,8,256], index: 0, kind: input, shape index: {}]   ;;  %s1306_s1 = inlined_call_operand.vmem [shape: bf16[8,72], index: 1, kind: input, shape index: {}]   ;;  %s1307_s2 = inlined_call_operand.vmem [shape: bf16[8,72], index: 2, kind: input, shape index: {}]   ;;  %s1308_s3 = inlined_call_operand.vmem [shape: bf16[9,1,256], index: 3, kind: input, shape index: {}]   ;;  %s1309_s4 = inlined_call_operand.hbm [shape: f32[2,8,256], index: 4, kind: output, shape index: {}]  }
   0x1   :  { %11 = vsyncpa [#allocation3 + $0x1], 0  ;;  %s952_s15 = smov 0   ;;  %s954_s16 = smov 0  }
   0x2   :  { %s956_s17 = smov 0   ;;  %s958_s18 = smov 0  }
   0x3 LB: > { %s973_s19 = sadd.s32 4294967295, %s915_s18   ;;  %s741_s20 = sadd.s32 4294967294, %s915_s18   ;;  %s915_s18 = sphi %s958_s18, %s1315_s18   ;;  %s911_s17 = sphi %s956_s17, %s1314_s17   ;;  %s907_s16 = sphi %s954_s16, %s1313_s16   ;;  %s903_s15 = sphi %s952_s15, %s1312_s15  }
   0x4   : > { %s977_s21 = sadd.s32 1, %s915_s18   ;;  %s113_s22 = sadd.s32 1, %s911_s17 }
   0x5   : > { %s110_s23 = ssub.s32 %s915_s18, %s977_s21  ;;  %p123_p0 = scmp.ne.s32.totalorder %s911_s17, %s907_s16 }
   0x6   : > { %p111_p1 = scmp.eq.s32.totalorder %s110_s23, 0  ;;  %p124_p2 = scmp.eq.s32.totalorder %s973_s19, 1 }
   0x7   : > { %p129_p3 = scmp.ne.s32.totalorder %s907_s16, %s903_s15  ;;  %p130_p4 = scmp.eq.s32.totalorder %s741_s20, 1 }
   0x8   : > { %s988_s24 = scalar_select %p111_p1, %s911_s17, %s113_s22  }
   0x9   : > { %p990_p5 = por %p124_p2, %p123_p0  ;;  %p994_p6 = por %p130_p4, %p129_p3 }
   0xa   : > { %p744_p7 = scmp.ge.s32.totalorder %s915_s18, 1  ;;  %p165_p8 = scmp.lt.s32.totalorder %s915_s18, 3 }
   0xc   : > { %p166_p9 = pnand %p744_p7, %p165_p8 }
   0xd   : > { %p191_p10 = scmp.lt.s32.totalorder (!%p166_p9), %s973_s19, 1  ;;  %s917_s6 = smov (!%p166_p9), 111  }
   0xe   : > { %169 = sbr.rel (%p166_p9) target bundleno = 730 (0x2da), region = 36  ;;  %s918_s7 = smov (!%p166_p9), 112  }
   0xf   : > { %s919_s8 = smov (!%p166_p9), 113   ;;  %s920_s9 = smov (!%p166_p9), 127  }
  0x10   : > { %s921_s10 = smov (!%p166_p9), 1   ;;  %s922_s11 = smov (!%p166_p9), 15  }
  0x11   : > { %s923_s12 = smov (!%p166_p9), 16   ;;  %s924_s13 = smov (!%p166_p9), 17  }
  0x13   : > { %s192_s27 = scalar_select %p191_p10, %s973_s19, 1  ;;  %v925_v4 = vmov 0   ;;  %v204_v5 = vlaneseq  ;;  %v751_v7 = vld [vmem:[%s1308_s3 + $0x8] sm:$0x3]  ;;  %v755_v8 = vld [vmem:[%s1308_s3 + $0x10] sm:$0x3] }
  0x14   : > { %527 = vmatprep.mubr.bf16.mxu0 %v925_v4  ;;  %656 = vmatprep.mubr.bf16.mxu1 %v925_v4  ;;  %v753_v9 = vld [vmem:[%s1308_s3 + $0xc] sm:$0x3]  ;;  %v754_v10 = vld [vmem:[%s1308_s3 + $0xe] sm:$0x3]  ;;  %v327_v11 = vunpack.c.l.bf16 %v751_v7  ;;  %v451_v13 = vunpack.c.l.bf16 %v755_v8  ;;  %v752_v15 = vld [vmem:[%s1308_s3 + $0xa] sm:$0x3] }
  0x15   : > { %s765_s28 = sshll.u32 %s192_s27, 3  ;;  %v213_v6 = vshrl.u32 %v204_v5, 7  ;;  %v389_v14 = vunpack.c.l.bf16 %v753_v9  ;;  %v420_v17 = vunpack.c.l.bf16 %v754_v10  ;;  %v749_v18 = vld [vmem:[%s1308_s3 + $0x4] sm:$0x3]  ;;  %v750_v19 = vld [vmem:[%s1308_s3 + $0x6] sm:$0x3]  ;;  %v358_v22 = vunpack.c.l.bf16 %v752_v15 }
  0x16   : > { %s195_s5 = scalar_lea.vmem %s1305_s0, %s765_s28  ;;  %v1042_v20 = vand.u32 127, %v204_v5  ;;  %v209_v24 = vld [vmem:[%s1308_s3] sm:$0x3]  ;;  %v748_v25 = vld [vmem:[%s1308_s3 + $0x2] sm:$0x3]  ;;  %v272_v28 = vunpack.c.l.bf16 %v749_v18  ;;  %v303_v29 = vunpack.c.l.bf16 %v750_v19  ;;  %vm488_vm4 = vcmask 1043456  }
  0x17   : > { %v197_v0 = vld [vmem:[%s195_s5] sm:$0xff]  ;;  %v1031_v12 = vsub.s32 0, %v213_v6  ;;  %v218_v16 = vsub.s32 2, %v213_v6  ;;  %v210_v34 = vunpack.c.l.bf16 %v209_v24  ;;  %v241_v35 = vunpack.c.l.bf16 %v748_v25  ;;  %s926_s28 = smov [#allocation2]  }
  0x18   : > { %v1005_v1 = vunpack.c.l.bf16 %v197_v0  ;;  %v1007_v2 = vunpack.c.h.bf16 %v197_v0  ;;  %vm415_vm0 = vcmp.lt.s32.totalorder %v1042_v20, 112  ;;  %vm446_vm1 = vcmp.lt.s32.totalorder %v1042_v20, 111  ;;  %s859_s29 = sshll.u32 %s926_s28, 4  ;;  %s860_s29 = int_to_ptr.vmem [resolvable:$false] %s859_s29 }
  0x19   : > { %v336_v21 = vrot.slane %v327_v11, %v218_v16  ;;  %v332_v23 = vrot.slane %v327_v11, %v1031_v12  ;;  %v456_v26 = vrot.slane %v451_v13, %v1031_v12  ;;  %v394_v27 = vrot.slane %v389_v14, %v1031_v12  ;;  %s861_s30 = scalar_lea.vmem %s860_s29, 512 }
  0x1a   : > { %v815_v3 = vpack.i.bf16 %v1007_v2, %v1005_v1  ;;  %v460_v30 = vrot.slane %v451_v13, %v218_v16  ;;  %v398_v31 = vrot.slane %v389_v14, %v218_v16  ;;  %v429_v32 = vrot.slane %v420_v17, %v218_v16 }
  0x1b   : > { %v425_v33 = vrot.slane %v420_v17, %v1031_v12  ;;  %v1057_v36 = vrot.slane %v336_v21, %v1031_v12  ;;  %v367_v37 = vrot.slane %v358_v22, %v218_v16  ;;  %v1060_v38 = vrot.slane %v332_v23, %v1031_v12 }
  0x1c   : > { %816 = vrot.lane.b32.xlu0 %v815_v3, %s917_s6  ;;  %826 = vrot.lane.b32.xlu1 %v815_v3, %s918_s7  ;;  %v363_v39 = vrot.slane %v358_v22, %v1031_v12  ;;  %vm384_vm2 = vcmp.lt.s32.totalorder %v1042_v20, 113  ;;  %vm353_vm3 = vcmp.lt.s32.totalorder %v1042_v20, 127  ;;  %v1066_v40 = vrot.slane %v456_v26, %v1031_v12 }
  0x1d   : > { %v1069_v41 = vrot.slane %v394_v27, %v1031_v12  ;;  %v281_v42 = vrot.slane %v272_v28, %v218_v16  ;;  %v312_v43 = vrot.slane %v303_v29, %v218_v16  ;;  %v1072_v44 = vrot.slane %v460_v30, %v1031_v12 }
  0x1e   : > { %v1075_v45 = vrot.slane %v398_v31, %v1031_v12  ;;  %v1078_v46 = vrot.slane %v429_v32, %v1031_v12  ;;  %v1081_v47 = vrot.slane %v425_v33, %v1031_v12  ;;  %v277_v48 = vrot.slane %v272_v28, %v1031_v12 }
  0x1f   : > { %v308_v49 = vrot.slane %v303_v29, %v1031_v12  ;;  %v219_v50 = vrot.slane %v210_v34, %v218_v16  ;;  %v250_v51 = vrot.slane %v241_v35, %v218_v16  ;;  %v1087_v52 = vmul.f32 %v1057_v36, %v1007_v2 }
  0x20   : > { %821 = vrot.lane.b32.xlu0 %v815_v3, %s919_s8  ;;  %831 = vrot.lane.b32.xlu1 %v815_v3, %s920_s9  ;;  %v1090_v53 = vrot.slane %v367_v37, %v1031_v12  ;;  %v1094_v54 = vmul.f32 %v1060_v38, %v1005_v1  ;;  %v1097_v55 = vrot.slane %v363_v39, %v1031_v12  ;;  %vm298_vm5 = vcmp.lt.s32.totalorder %v1042_v20, 1 }
  0x21   : > { %vm267_vm6 = vcmp.lt.s32.totalorder %v1042_v20, 15  ;;  %v1102_v58 = vrot.slane %v281_v42, %v1031_v12  ;;  %v1105_v59 = vrot.slane %v312_v43, %v1031_v12  ;;  %v215_v60 = vrot.slane %v210_v34, %v1031_v12 }
  0x22   : > { %v246_v61 = vrot.slane %v241_v35, %v1031_v12  ;;  %v1110_v4 = vrot.slane %v277_v48, %v1031_v12  ;;  %v1113_v5 = vrot.slane %v308_v49, %v1031_v12  ;;  %v1116_v6 = vrot.slane %v219_v50, %v1031_v12 }
  0x23   : > { %v1119_v7 = vrot.slane %v250_v51, %v1031_v12  ;;  %vm236_vm7 = vcmp.lt.s32.totalorder %v1042_v20, 16  ;;  %vm206_vm8 = vcmp.lt.s32.totalorder %v1042_v20, 17  ;;  %v1134_v17 = vrot.slane %v215_v60, %v1031_v12 }
  0x24   : > { %841 = vrot.lane.b32.xlu1 %v815_v3, %s921_s10  ;;  %836 = vrot.lane.b32.xlu0 %v815_v3, %s922_s11  ;;  %v1137_v18 = vrot.slane %v246_v61, %v1031_v12  ;;  %vm484_vm9 = vcmask 588800  }
  0x28   : > { %851 = vrot.lane.b32.xlu1 %v815_v3, %s923_s12  ;;  %846 = vrot.lane.b32.xlu0 %v815_v3, %s924_s13 }
  0x8e   : > { %v817_v56 = vpop.permute.xlu0 %816  ;;  %v827_v57 = vpop.permute.xlu1 %826 }
  0x8f   : > { %v819_v62 = vunpack.i.h.bf16 %v817_v56  ;;  %v818_v63 = vunpack.i.l.bf16 %v817_v56  ;;  %v829_v0 = vunpack.i.h.bf16 %v827_v57  ;;  %v828_v3 = vunpack.i.l.bf16 %v827_v57 }
  0x91   : > { %v416_v8 = vsel %vm415_vm0, %v828_v3, %v829_v0  ;;  %v417_v9 = vsel %vm415_vm0, %v829_v0, %v828_v3  ;;  %v448_v10 = vsel %vm446_vm1, %v819_v62, %v818_v63  ;;  %v447_v11 = vsel %vm446_vm1, %v818_v63, %v819_v62 }
  0x92   : > { %v822_v13 = vpop.permute.xlu0 %821  ;;  %v832_v14 = vpop.permute.xlu1 %831  ;;  %v472_v15 = vmul.f32 %v1072_v44, %v448_v10  ;;  %v471_v16 = vmul.f32 %v1066_v40, %v447_v11  ;;  %v441_v26 = vmul.f32 %v1078_v46, %v417_v9  ;;  %v440_v27 = vmul.f32 %v1081_v47, %v416_v8 }
  0x93   : > { %v824_v19 = vunpack.i.h.bf16 %v822_v13  ;;  %v823_v21 = vunpack.i.l.bf16 %v822_v13  ;;  %v834_v22 = vunpack.i.h.bf16 %v832_v14  ;;  %v833_v23 = vunpack.i.l.bf16 %v832_v14 }
  0x94   : > { %v483_v24 = vpack.c.bf16 %v472_v15, %v472_v15  ;;  %v482_v25 = vpack.c.bf16 %v471_v16, %v471_v16 }
  0x95   : > { %v385_v28 = vsel %vm384_vm2, %v823_v21, %v824_v19  ;;  %v386_v29 = vsel %vm384_vm2, %v824_v19, %v823_v21  ;;  %v354_v12 = vsel %vm353_vm3, %v833_v23, %v834_v22  ;;  %v355_v30 = vsel %vm353_vm3, %v834_v22, %v833_v23 }
  0x96   : > { %756 = vmatprep.subr.msk.bf16.mxu0 %vm488_vm4, %v483_v24  ;;  %v490_v31 = vsel %vm488_vm4, %v482_v25, 0  ;;  %v842_v32 = vpop.permute.xlu1 %841  ;;  %v837_v33 = vpop.permute.xlu0 %836  ;;  %v410_v34 = vmul.f32 %v1075_v45, %v386_v29  ;;  %v409_v35 = vmul.f32 %v1069_v41, %v385_v28  ;;  %v379_v37 = vmul.f32 %v1090_v53, %v355_v30 }
  0x97   : > { %502 = vmatpush1.bf16.msra.mxu0 %v490_v31  ;;  %v844_v39 = vunpack.i.h.bf16 %v842_v32  ;;  %v843_v42 = vunpack.i.l.bf16 %v842_v32  ;;  %v839_v43 = vunpack.i.h.bf16 %v837_v33  ;;  %v838_v48 = vunpack.i.l.bf16 %v837_v33 }
  0x98   : > { %v481_v49 = vpack.c.bf16 %v441_v26, %v410_v34  ;;  %v480_v50 = vpack.c.bf16 %v440_v27, %v409_v35  ;;  %v479_v51 = vpack.c.bf16 %v379_v37, %v1087_v52  ;;  %v378_v56 = vmul.f32 %v1097_v55, %v354_v12  ;;  %v473_v12 = vld [vmem:[%s1306_s1] sm:$0xf] }
  0x99   : > { %v299_v57 = vsel %vm298_vm5, %v843_v42, %v844_v39  ;;  %v300_v60 = vsel %vm298_vm5, %v844_v39, %v843_v42  ;;  %v268_v61 = vsel %vm267_vm6, %v838_v48, %v839_v43  ;;  %v269_v62 = vsel %vm267_vm6, %v839_v43, %v838_v48 }
  0x9a   : > { %503 = vmatprep.subr.bf16.mxu0 %v481_v49  ;;  %v852_v63 = vpop.permute.xlu1 %851  ;;  %v847_v0 = vpop.permute.xlu0 %846  ;;  %v478_v3 = vpack.c.bf16 %v378_v56, %v1094_v54  ;;  %v293_v52 = vmul.f32 %v1102_v58, %v268_v61  ;;  %v324_v8 = vmul.f32 %v1105_v59, %v299_v57  ;;  %v292_v9 = vmul.f32 %v1110_v4, %v269_v62 }
  0x9b   : > { %504 = vmatpush1.bf16.msra.mxu0 %v480_v50  ;;  %v854_v10 = vunpack.i.h.bf16 %v852_v63  ;;  %v853_v11 = vunpack.i.l.bf16 %v852_v63  ;;  %v849_v13 = vunpack.i.h.bf16 %v847_v0  ;;  %v848_v14 = vunpack.i.l.bf16 %v847_v0 }
  0x9c   : > { %505 = vmatprep.subr.bf16.mxu0 %v479_v51  ;;  %v477_v15 = vpack.c.bf16 %v324_v8, %v293_v52  ;;  %v323_v16 = vmul.f32 %v1113_v5, %v300_v60 }
  0x9d   : > { %v237_v19 = vsel %vm236_vm7, %v853_v11, %v854_v10  ;;  %v238_v54 = vsel %vm236_vm7, %v854_v10, %v853_v11  ;;  %v207_v21 = vsel %vm206_vm8, %v848_v14, %v849_v13  ;;  %v208_v22 = vsel %vm206_vm8, %v849_v13, %v848_v14 }
  0x9e   : > { %v231_v23 = vmul.f32 %v1116_v6, %v207_v21  ;;  %v262_v24 = vmul.f32 %v1119_v7, %v237_v19  ;;  %v476_v25 = vpack.c.bf16 %v323_v16, %v292_v9  ;;  %v230_v26 = vmul.f32 %v1134_v17, %v208_v22 }
  0x9f   : > { %506 = vmatpush1.bf16.msra.mxu0 %v478_v3  ;;  %v261_v27 = vmul.f32 %v1137_v18, %v238_v54 }
  0xa0   : > { %507 = vmatprep.subr.bf16.mxu0 %v477_v15  ;;  %v475_v28 = vpack.c.bf16 %v262_v24, %v231_v23 }
  0xa1   : > { %v474_v29 = vpack.c.bf16 %v261_v27, %v230_v26 }
  0xa3   : > { %508 = vmatpush1.bf16.msra.mxu0 %v476_v25 }
  0xa4   : > { %509 = vmatprep.subr.bf16.mxu0 %v475_v28 }
  0xa7   : > { %510 = vmatpush1.bf16.msra.mxu0 %v474_v29 }
  0xaa   : > { %757 = vmatmul.mubr.msk.bf16.vlgmr.msra.gmra.mxu0 %vm484_vm9, %v473_v12 }
 0x16a   : > { %v529_v30 = vpop.f32.mrf.mxu0 }
 0x16b   : > { %v536_v31 = vmax.f32 %v529_v30, 0.0 }
 0x16c   : > { %v531_v32 = vpop.f32.mrf.mxu0 }
 0x16d   : > { %v537_v33 = vmax.f32 %v531_v32, 0.0  ;;  %596 = vrot.lane.b32.xlu0 %v536_v31, %s917_s6 }
 0x16e   : > { %v533_v34 = vpop.f32.mrf.mxu0 }
 0x16f   : > { %598 = vrot.lane.b32.xlu1 %v537_v33, %s917_s6 }
 0x170   : > { %v534_v35 = vpop.f32.mrf.mxu0 }
 0x171   : > { %580 = vrot.lane.b32.xlu0 %v536_v31, %s919_s8 }
 0x173   : > { %582 = vrot.lane.b32.xlu1 %v537_v33, %s919_s8  ;;  %s188_s8 = sand.u32 1, %s907_s16  }
 0x175   : > { %588 = vrot.lane.b32.xlu0 %v536_v31, %s918_s7 }
 0x177   : > { %590 = vrot.lane.b32.xlu1 %v537_v33, %s918_s7 }
 0x179   : > { %572 = vrot.lane.b32.xlu0 %v536_v31, %s920_s9 }
 0x17b   : > { %574 = vrot.lane.b32.xlu1 %v537_v33, %s920_s9  ;;  %s745_s9 = sshll.u32 %s188_s8, 4 }
 0x17d   : > { %554 = vrot.lane.b32.xlu0 %v536_v31, %s922_s11 }
 0x17f   : > { %556 = vrot.lane.b32.xlu1 %v537_v33, %s922_s11  ;;  %s190_s11 = scalar_lea.vmem [#allocation2], %s745_s9 }
 0x181   : > { %562 = vrot.lane.b32.xlu0 %v536_v31, %s921_s10 }
 0x183   : > { %564 = vrot.lane.b32.xlu1 %v537_v33, %s921_s10  ;;  %s766_s10 = sshll.u32 %s973_s19, 8  ;;  %s668_s19 = scalar_lea.sflag [#allocation3], %s188_s8 }
 0x184   : > { %s1264_s23 = scalar_lea.hbm %s1309_s4, %s766_s10 }
 0x185   : > { %538 = vrot.lane.b32.xlu0 %v536_v31, %s924_s13 }
 0x187   : > { %540 = vrot.lane.b32.xlu1 %v537_v33, %s924_s13 }
 0x189   : > { %546 = vrot.lane.b32.xlu0 %v536_v31, %s923_s12 }
 0x18b   : > { %548 = vrot.lane.b32.xlu1 %v537_v33, %s923_s12  ;;  %s682_s12 = sshll.u32 %s190_s11, 4  ;;  %s1266_s12 = int_to_ptr.vmem [resolvable:$true] %s682_s12 }
 0x18c   : > { %s855_s27 = scalar_lea.vmem %s1266_s12, 256  ;;  %p862_p0 = scmp.lt.s32.totalorder %s1266_s12, %s860_s29 }
 0x18d   : > { %p856_p11 = scmp.ne.s32.totalorder %s1266_s12, %s855_s27  ;;  %p863_p1 = scmp.lt.s32.totalorder %s861_s30, %s855_s27 }
 0x18f   : > { %p857_p12 = pnand %p856_p11, %p990_p5  ;;  %p864_p2 = por %p863_p1, %p862_p0 }
 0x191   : > { %p858_p13 = pneg %p857_p12 }
 0x193   : > { %p865_p3 = pnand %p864_p2, %p858_p13 }
 0x1df   : > { %v597_v37 = vpop.permute.xlu0 %596 }
 0x1e1   : > { %v599_v39 = vpop.permute.xlu1 %598 }
 0x1e2   : > { %v600_v42 = vsel %vm446_vm1, %v597_v37, %v599_v39  ;;  %v601_v43 = vsel %vm446_vm1, %v599_v39, %v597_v37 }
 0x1e3   : > { %v602_v48 = vmul.f32 %v600_v42, %v1066_v40  ;;  %v581_v49 = vpop.permute.xlu0 %580  ;;  %v603_v50 = vmul.f32 %v601_v43, %v1072_v44 }
 0x1e5   : > { %v583_v51 = vpop.permute.xlu1 %582  ;;  %v614_v56 = vpack.c.bf16 %v603_v50, %v603_v50  ;;  %v613_v57 = vpack.c.bf16 %v602_v48, %v602_v48  ;;  %v604_v48 = vld [vmem:[%s1307_s2] sm:$0xf] }
 0x1e6   : > { %v584_v62 = vsel %vm384_vm2, %v581_v49, %v583_v51  ;;  %v585_v63 = vsel %vm384_vm2, %v583_v51, %v581_v49 }
 0x1e7   : > { %v589_v60 = vpop.permute.xlu0 %588  ;;  %758 = vmatprep.subr.msk.bf16.mxu1 %vm488_vm4, %v614_v56  ;;  %v619_v61 = vsel %vm488_vm4, %v613_v57, 0  ;;  %v586_v3 = vmul.f32 %v584_v62, %v1069_v41  ;;  %v587_v52 = vmul.f32 %v585_v63, %v1075_v45  ;;  %v571_v45 = vmul.f32 %v537_v33, %v1057_v36 }
 0x1e8   : > { %631 = vmatpush1.bf16.msra.mxu1 %v619_v61 }
 0x1e9   : > { %v591_v0 = vpop.permute.xlu1 %590 }
 0x1ea   : > { %v592_v40 = vsel %vm415_vm0, %v589_v60, %v591_v0  ;;  %v593_v44 = vsel %vm415_vm0, %v591_v0, %v589_v60 }
 0x1eb   : > { %v594_v8 = vmul.f32 %v592_v40, %v1081_v47  ;;  %v595_v9 = vmul.f32 %v593_v44, %v1078_v46  ;;  %v573_v10 = vpop.permute.xlu0 %572  ;;  %v570_v46 = vmul.f32 %v536_v31, %v1060_v38 }
 0x1ed   : > { %v575_v11 = vpop.permute.xlu1 %574  ;;  %v612_v13 = vpack.c.bf16 %v595_v9, %v587_v52  ;;  %v611_v14 = vpack.c.bf16 %v594_v8, %v586_v3 }
 0x1ee   : > { %v576_v15 = vsel %vm353_vm3, %v573_v10, %v575_v11  ;;  %v577_v16 = vsel %vm353_vm3, %v575_v11, %v573_v10 }
 0x1ef   : > { %v578_v19 = vmul.f32 %v576_v15, %v1097_v55  ;;  %v579_v41 = vmul.f32 %v577_v16, %v1090_v53  ;;  %v555_v54 = vpop.permute.xlu0 %554  ;;  %632 = vmatprep.subr.bf16.mxu1 %v612_v13 }
 0x1f0   : > { %633 = vmatpush1.bf16.msra.mxu1 %v611_v14 }
 0x1f1   : > { %v557_v47 = vpop.permute.xlu1 %556  ;;  %v610_v21 = vpack.c.bf16 %v579_v41, %v571_v45  ;;  %v609_v22 = vpack.c.bf16 %v578_v19, %v570_v46 }
 0x1f2   : > { %v558_v24 = vsel %vm267_vm6, %v555_v54, %v557_v47  ;;  %v559_v55 = vsel %vm267_vm6, %v557_v47, %v555_v54 }
 0x1f3   : > { %v563_v23 = vpop.permute.xlu0 %562  ;;  %634 = vmatprep.subr.bf16.mxu1 %v610_v21  ;;  %v560_v38 = vmul.f32 %v559_v55, %v1110_v4  ;;  %v561_v26 = vmul.f32 %v558_v24, %v1102_v58 }
 0x1f4   : > { %635 = vmatpush1.bf16.msra.mxu1 %v609_v22 }
 0x1f5   : > { %v565_v53 = vpop.permute.xlu1 %564 }
 0x1f6   : > { %v566_v25 = vsel %vm298_vm5, %v563_v23, %v565_v53  ;;  %v567_v36 = vsel %vm298_vm5, %v565_v53, %v563_v23 }
 0x1f7   : > { %v568_v27 = vmul.f32 %v567_v36, %v1113_v5  ;;  %v569_v28 = vmul.f32 %v566_v25, %v1105_v59  ;;  %v539_v29 = vpop.permute.xlu0 %538 }
 0x1f9   : > { %v541_v12 = vpop.permute.xlu1 %540  ;;  %v608_v30 = vpack.c.bf16 %v569_v28, %v561_v26  ;;  %v607_v31 = vpack.c.bf16 %v568_v27, %v560_v38 }
 0x1fa   : > { %v542_v32 = vsel %vm206_vm8, %v539_v29, %v541_v12  ;;  %v543_v33 = vsel %vm206_vm8, %v541_v12, %v539_v29 }
 0x1fb   : > { %636 = vmatprep.subr.bf16.mxu1 %v608_v30  ;;  %v547_v4 = vpop.permute.xlu0 %546  ;;  %v544_v5 = vmul.f32 %v543_v33, %v1134_v17  ;;  %v545_v35 = vmul.f32 %v542_v32, %v1116_v6 }
 0x1fc   : > { %637 = vmatpush1.bf16.msra.mxu1 %v607_v31 }
 0x1fd   : > { %v549_v34 = vpop.permute.xlu1 %548 }
 0x1fe   : > { %v550_v58 = vsel %vm236_vm7, %v547_v4, %v549_v34  ;;  %v551_v59 = vsel %vm236_vm7, %v549_v34, %v547_v4 }
 0x1ff   : > { %v552_v37 = vmul.f32 %v551_v59, %v1137_v18  ;;  %v553_v39 = vmul.f32 %v550_v58, %v1119_v7 }
 0x201   : > { %v606_v42 = vpack.c.bf16 %v553_v39, %v545_v35  ;;  %v605_v43 = vpack.c.bf16 %v552_v37, %v544_v5 }
 0x203   : > { %638 = vmatprep.subr.bf16.mxu1 %v606_v42 }
 0x204   : > { %639 = vmatpush1.bf16.msra.mxu1 %v605_v43 }
 0x207   : > { %759 = vmatmul.mubr.msk.bf16.vlgmr.msra.gmra.mxu1 %vm484_vm9, %v604_v48 }
 0x2c7   : > { %v658_v20 = vpop.f32.mrf.mxu1 }
 0x2c8   : > { %v659_v6 = vadd.f32 %v658_v20, %v1005_v1 }
 0x2c9   : > { %v660_v7 = vpop.f32.mrf.mxu1 }
 0x2ca   : > { %665 = vst [vmem:[%s190_s11] sm:$0xff] %v659_v6  ;;  %v661_v17 = vadd.f32 %v660_v7, %v1007_v2 }
 0x2cb   : > { %v662_v18 = vpop.f32.mrf.mxu1 }
 0x2cc   : > { %666 = vst [vmem:[%s190_s11 + $0x8] sm:$0xff] %v661_v17 }
 0x2cd   : > { %v663_v49 = vpop.f32.mrf.mxu1 }
 0x2ce   : > { %868 = shalt.err (!%p865_p3)
}
 0x2cf   : > { %s869_s5 = scalar_lea.hbm %s1264_s23, 256  ;;  %s873_s6 = scalar_lea.hbm %s1309_s4, 512 }
 0x2d0   : > { %p870_p4 = scmp.ne.s32.totalorder %s1264_s23, %s869_s5  ;;  %p874_p9 = scmp.lt.s32.totalorder %s1264_s23, %s1309_s4 }
 0x2d1   : > { %p875_p10 = scmp.lt.s32.totalorder %s873_s6, %s869_s5 }
 0x2d2   : > { %p871_p7 = pnand %p870_p4, %p990_p5 }
 0x2d3   : > { %p876_p11 = por %p875_p10, %p874_p9 }
 0x2d4   : > { %p872_p8 = pneg %p871_p7 }
 0x2d6   : > { %p877_p12 = pnand %p876_p11, %p872_p8 }
 0x2d8   : > { %880 = shalt.err (!%p877_p12)
}
 0x2d9   : > { %767 = dma.vmem_to_hbm [thread:$0]  (%p990_p5), %s1266_s12, 256, %s1264_s23, %s668_s19  }
 0x2da PF: > { %p773_p13 = scmp.ge.s32.totalorder %s915_s18, 2  ;;  %s694_s9 = sand.u32 1, %s903_s15  }
 0x2db   : > { %s695_s10 = scalar_lea.sflag [#allocation3], %s694_s9 }
 0x2dc   : > { %p770_p0 = pnand %p773_p13, %p994_p6 }
 0x2de   : > { %p771_p1 = pneg %p770_p0 }
 0x2e0   : > { %898 = dma.done.wait (%p771_p1), %s695_s10, 256  }
 0x2e1   : > { %900 = vsyncadd (%p771_p1), %s695_s10, 4294967040  ;;  %p14_p2 = scmp.ge.s32.totalorder %s977_s21, 4   ;;  %s1312_s15 = smov %s907_s16 }
 0x2e2   : > { %s1313_s16 = smov %s911_s17  ;;  %s1314_s17 = smov %s988_s24 }
 0x2e3   : > { %s1315_s18 = smov %s977_s21  ;;  %16 = sbr.rel (!%p14_p2) target bundleno = 3 (0x3), region = 79 }
 0x2e8   :  { %700 = vsyncpa [#allocation3], 1 }
 0x2e9   :  { %702 = vsyncpa [#allocation3 + $0x1], 1 }

</bundles_post_ra>
